<compile_context>
chip_gen: v6e
topology: v6e:2x2x1
jax: 0.10.0
libtpu: 0.0.40
codegen_flags: <defaults>
</compile_context>

<pallas_src>
import jax
import jax.numpy as jnp
from jax.experimental import pallas as pl
from jax.experimental.pallas import tpu as pltpu


def _normalization_kernel(scale_ref, bias_ref, img_ref, out_ref):
    # scale_ref / bias_ref : VMEM (row_block, 1) f32 -> broadcast along lanes
    # img_ref / out_ref    : VMEM (row_block, col_block)
    x = img_ref[...].astype(jnp.float32)
    out_ref[...] = (x * scale_ref[...] + bias_ref[...]).astype(out_ref.dtype)


def _cdiv(a, b):
    return -(-a // b)


def _vmem_capacity_bytes():
    try:
        return int(pltpu.get_tpu_info().vmem_capacity_bytes)
    except Exception:
        return 64 << 20  # conservative fallback (v7x per-TensorCore VMEM)


def _pick_blocks(rows, cols, elem_bytes, pack, max_tile_bytes):
    """Pick a lane-dense (row_block, col_block) tile.

    Order: full tile -> full-width row stripes sized to the byte budget ->
    split the lane axis (any multiple of 128) only if a single 8-row full-width
    stripe already exceeds the budget.
    """
    total_bytes = rows * cols * elem_bytes
    if total_bytes <= max_tile_bytes:
        row_block, col_block = rows, cols
    else:
        max_rows = max_tile_bytes // (cols * elem_bytes)
        if max_rows >= pack:
            # Full-width stripes, row count rounded to the sublane pack.
            row_block = min(rows, (max_rows // pack) * pack)
            col_block = cols
        elif max_rows >= 8:
            # Still legal (multiple of 8), just not fully packed for <32-bit.
            row_block = (max_rows // 8) * 8
            col_block = cols
        else:
            # Even 8 full-width rows blow the budget -> split the lane axis.
            row_block = rows if rows <= pack else pack
            max_cols = max_tile_bytes // (row_block * elem_bytes)
            col_block = min(cols, max(128, (max_cols // 128) * 128))

    # v7x megacore balance: a medium-sized image that fits one tile would leave
    # one TensorCore idle; split rows into two blocks (costs one ~0.35us grid
    # step on single-core v5e/v6e, negligible).
    if (_cdiv(rows, row_block) * _cdiv(cols, col_block) == 1
            and total_bytes > (1 << 20) and rows >= 2 * pack):
        half = _cdiv(rows, 2)
        row_block = min(rows, _cdiv(half, pack) * pack)

    return row_block, col_block


def normalization(img, mean, std):
    """(img - mean[:,None,None]) / std[:,None,None] for NCHW img."""
    img = jnp.asarray(img)
    mean = jnp.asarray(mean, dtype=jnp.float32)
    std = jnp.asarray(std, dtype=jnp.float32)
    N, C, H, W = img.shape
    assert mean.shape == (C,) and std.shape == (C,)

    # PyTorch's (img - mean)/std yields a float result; promote int images.
    out_dtype = img.dtype if jnp.issubdtype(img.dtype, jnp.floating) else jnp.float32

    # Fold normalization into per-channel scale/bias (C elements, negligible).
    scale_c = (1.0 / std).astype(jnp.float32)
    bias_c = (-mean / std).astype(jnp.float32)

    rows, cols = N * C, H * W
    img2 = img.reshape(rows, cols)                  # lane-dense 2D view
    scale = jnp.tile(scale_c, N).reshape(rows, 1)   # per-row scalar (row = n*C + c)
    bias = jnp.tile(bias_c, N).reshape(rows, 1)

    in_bytes = img.dtype.itemsize
    out_bytes = jnp.dtype(out_dtype).itemsize
    elem_bytes = max(in_bytes, out_bytes)
    pack = max(32 // in_bytes, 32 // out_bytes)     # sublane pack: 8/16/32

    vmem_cap = _vmem_capacity_bytes()
    max_tile_bytes = min(4 << 20, vmem_cap // 16)   # generation-aware budget

    row_block, col_block = _pick_blocks(rows, cols, elem_bytes, pack, max_tile_bytes)
    n_row = _cdiv(rows, row_block)
    n_col = _cdiv(cols, col_block)

    # Put the axis with more blocks first so the leading (megacore-sharded)
    # parallel axis is actually populated on v7x.
    if n_col > n_row:
        grid = (n_col, n_row)
        img_map = lambda j, i: (i, j)
        vec_map = lambda j, i: (i, 0)
    else:
        grid = (n_row, n_col)
        img_map = lambda i, j: (i, j)
        vec_map = lambda i, j: (i, 0)

    # Scoped-VMEM budget: double-buffered in+out tiles + double-buffered
    # (row_block, 1) scale/bias tiles (lane-padded to 128) + slack.  This keeps
    # us safely above the v5e 16 MiB scoped default and well under v7x's
    # 64 MiB physical VMEM.
    vmem_needed = (2 * row_block * col_block * (in_bytes + out_bytes)
                   + 2 * 2 * row_block * 128 * 4
                   + (2 << 20))
    vmem_limit = int(max(vmem_needed, 16 << 20))

    out2 = pl.pallas_call(
        _normalization_kernel,
        out_shape=jax.ShapeDtypeStruct((rows, cols), out_dtype),
        grid=grid,
        in_specs=[
            pl.BlockSpec((row_block, 1), vec_map),           # scale
            pl.BlockSpec((row_block, 1), vec_map),           # bias
            pl.BlockSpec((row_block, col_block), img_map),   # img
        ],
        out_specs=pl.BlockSpec((row_block, col_block), img_map),
        compiler_params=pltpu.CompilerParams(
            dimension_semantics=("parallel", "parallel"),
            vmem_limit_bytes=vmem_limit),
    )(scale, bias, img2)

    return out2.reshape(N, C, H, W)


if __name__ == "__main__":
    key = jax.random.PRNGKey(0)

    # Small shapes consistent with the module: batch=2, channels=4, spatial=16.
    N, C, H, W = 2, 4, 16, 16
    img = jax.random.uniform(key, (N, C, H, W), dtype=jnp.float32)

    # Deterministic per-channel normalization constants (ImageNet-like,
    # extended to 4 channels for this synthetic test).
    mean = jnp.array([0.485, 0.456, 0.406, 0.50], dtype=jnp.float32)
    std = jnp.array([0.229, 0.224, 0.225, 0.25], dtype=jnp.float32)

    out = normalization(img, mean, std)
    out = jax.block_until_ready(out)

    # Reference (plain JAX) check of the PyTorch semantics.
    ref = (img - mean[None, :, None, None]) / std[None, :, None, None]
    assert out.shape == img.shape and out.dtype == img.dtype
    assert jnp.allclose(out, ref, atol=1e-5, rtol=1e-5)

    print("KERNEL_OK")
</pallas_src>

<mosaic_0001>
module attributes {stable_mosaic.version = 11 : i64} {
  func.func @_normalization_kernel(%arg0: i32, %arg1: i32, %arg2: memref<8x1xf32, #tpu.memory_space<vmem>>, %arg3: memref<8x1xf32, #tpu.memory_space<vmem>>, %arg4: memref<8x256xf32, #tpu.memory_space<vmem>>, %arg5: memref<8x256xf32, #tpu.memory_space<vmem>>) attributes {dimension_semantics = [#tpu.dimension_semantics<parallel>, #tpu.dimension_semantics<parallel>], iteration_bounds = array<i64: 1, 1>, scalar_prefetch = 0 : i64, scratch_operands = 0 : i64, tpu.core_type = #tpu.core_type<tc>, window_params = [{transform_indices = @transform_0, window_bounds = array<i64: 8, 1>}, {transform_indices = @transform_1, window_bounds = array<i64: 8, 1>}, {transform_indices = @transform_2, window_bounds = array<i64: 8, 256>}, {transform_indices = @transform_3, window_bounds = array<i64: 8, 256>}]} {
    %c0 = arith.constant 0 : index
    %c0_0 = arith.constant 0 : index
    %0 = vector.load %arg4[%c0, %c0_0] : memref<8x256xf32, #tpu.memory_space<vmem>>, vector<8x256xf32>
    %c0_1 = arith.constant 0 : index
    %c0_2 = arith.constant 0 : index
    %1 = vector.load %arg2[%c0_1, %c0_2] : memref<8x1xf32, #tpu.memory_space<vmem>>, vector<8x1xf32>
    %2 = vector.broadcast %1 : vector<8x1xf32> to vector<8x256xf32>
    %3 = arith.mulf %0, %2 : vector<8x256xf32>
    %c0_3 = arith.constant 0 : index
    %c0_4 = arith.constant 0 : index
    %4 = vector.load %arg3[%c0_3, %c0_4] : memref<8x1xf32, #tpu.memory_space<vmem>>, vector<8x1xf32>
    %5 = vector.broadcast %4 : vector<8x1xf32> to vector<8x256xf32>
    %6 = arith.addf %3, %5 : vector<8x256xf32>
    %c0_5 = arith.constant 0 : index
    %c0_6 = arith.constant 0 : index
    %7 = vector.load %arg5[%c0_5, %c0_6] : memref<8x256xf32, #tpu.memory_space<vmem>>, vector<8x256xf32>
    tpu.vector_store %arg5[%c0_5, %c0_6], %6 {strides = array<i32>} : memref<8x256xf32, #tpu.memory_space<vmem>>, vector<8x256xf32>,
    return
  }
  func.func @transform_0(%arg0: i32, %arg1: i32) -> (i32, i32) {
    %c0_i32 = arith.constant 0 : i32
    %c0_i32_0 = arith.constant 0 : i32
    return %arg0, %c0_i32 : i32, i32
  }
  func.func @transform_1(%arg0: i32, %arg1: i32) -> (i32, i32) {
    %c0_i32 = arith.constant 0 : i32
    %c0_i32_0 = arith.constant 0 : i32
    return %arg0, %c0_i32 : i32, i32
  }
  func.func @transform_2(%arg0: i32, %arg1: i32) -> (i32, i32) {
    %c0_i32 = arith.constant 0 : i32
    return %arg0, %arg1 : i32, i32
  }
  func.func @transform_3(%arg0: i32, %arg1: i32) -> (i32, i32) {
    %c0_i32 = arith.constant 0 : i32
    return %arg0, %arg1 : i32, i32
  }
}

</mosaic_0001>

<bundles_post_ra>
// kernel: tpu_custom_call.1
= control target key start
LH: loop header
LB: loop body
LE: loop exit
PB: predicated region body
PF: predicated region fallthrough
CT: control target
= control target key end

     0   :  { %v74_v1 = vmov 0   ;;  %s111_s0 = inlined_call_operand.vmem [shape: f32[8,1], index: 0, kind: input, shape index: {}]   ;;  %s112_s1 = inlined_call_operand.vmem [shape: f32[8,1], index: 1, kind: input, shape index: {}]   ;;  %s113_s2 = inlined_call_operand.vmem [shape: f32[8,256], index: 2, kind: input, shape index: {}]   ;;  %s114_s3 = inlined_call_operand.hbm [shape: f32[8,256], index: 3, kind: output, shape index: {}]  }
   0x1   :  { %v17_v0 = vld [vmem:[%s111_s0] sm:$0xff]  ;;  %51 = vset.pattern.permute.xlu0 %v74_v1 }
   0x2   :  { %8 = vsyncpa [#allocation3], 0  ;;  %20 = vperm.xlu0 %51, %v17_v0   ;;  %v25_v2 = vld [vmem:[%s112_s1] sm:$0xff]  ;;  %v16_v5 = vld [vmem:[%s113_s2 + $0x8] sm:$0xff]  ;;  %s75_s20 = smov [#allocation2]  }
   0x3   :  { %v15_v4 = vld [vmem:[%s113_s2] sm:$0xff]  ;;  %s41_s0 = sshll.u32 %s75_s20, 4  ;;  %s42_s0 = int_to_ptr.vmem [resolvable:$true] %s41_s0 }
   0x4   :  { %s52_s1 = scalar_lea.vmem %s42_s0, 256  ;;  %p57_p1 = scmp.lt.s32.totalorder %s42_s0, %s42_s0 }
   0x5   :  { %p53_p0 = scmp.ne.s32.totalorder %s42_s0, %s52_s1  ;;  %p58_p2 = scmp.lt.s32.totalorder %s52_s1, %s52_s1 }
   0x6   :  { %28 = vperm.xlu0 %51, %v25_v2  }
   0x7   :  { %p59_p3 = por %p58_p2, %p57_p1 }
   0x9   :  { %p60_p4 = pnand %p59_p3, %p53_p0 }
  0x7d   :  { %v21_v3 = vpop.permute.xlu0 %20 }
  0x7e   :  { %v23_v6 = vmul.f32 %v21_v3, %v15_v4  ;;  %v24_v7 = vmul.f32 %v21_v3, %v16_v5 }
  0x81   :  { %v29_v8 = vpop.permute.xlu0 %28 }
  0x82   :  { %v31_v9 = vadd.f32 %v29_v8, %v23_v6  ;;  %v32_v10 = vadd.f32 %v29_v8, %v24_v7 }
  0x84   :  { %33 = vst [vmem:[#allocation2] sm:$0xff] %v31_v9  ;;  %34 = vst [vmem:[#allocation2 + $0x8] sm:$0xff] %v32_v10 }
  0x85   :  { %63 = shalt.err (!%p60_p4)
}
  0x86   :  { %44 = dma.vmem_to_hbm [thread:$0]  %s42_s0, 256, %s114_s3, [#allocation3]  }
  0x87   :  { %72 = dma.done.wait [#allocation3], 256  }
  0x88   :  { %73 = vsyncadd [#allocation3], 4294967040 }
  0x89   :  { %48 = vsyncpa [#allocation3], 1 }

</bundles_post_ra>
